<compile_context>
chip_gen: v7x
topology: tpu7x:2x2x1
jax: 0.10.0
libtpu: 0.0.40
codegen_flags: <defaults>
</compile_context>

<pallas_src>
import jax
import jax.numpy as jnp
from jax.experimental import pallas as pl
from jax.experimental.pallas import tpu as pltpu

LANE = 128           # vreg lane width
ACC_SUBLANES = 8     # vreg sublane count -> accumulator tile (8, 128)
TM_MAX = 4096        # rows/block: 4096*128*4B = 2 MiB per f32 block -> ~12 MiB double-buffered
SUBLANE_ALIGN = 32   # sublane alignment safe for f32 / bf16 / 8-bit packings
NCORES = 2           # leading parallel grid axis (both TCs on v7x; no-op on v5e/v6e)
VMEM_LIMIT = 48 * 1024 * 1024  # headroom under v7x's 64 MiB physical VMEM


def _round_up(x, d):
    return (x + d - 1) // d * d


def _make_kernel(weighted: bool, loss_type: str):
    if loss_type == "L2":
        elem = lambda x: x * x
    elif loss_type == "L1":
        elem = jnp.abs
    else:
        raise NotImplementedError(f"loss_type {loss_type!r} not supported")

    def _fold(x):
        # (tm, 128) -> (8, 128) partial sum. The reshape only groups whole
        # (8, 128) vreg tiles (a view); the axis-0 sum is pure VPU adds.
        tm = x.shape[0]
        return jnp.sum(x.reshape(tm // ACC_SUBLANES, ACC_SUBLANES, LANE), axis=0)

    if weighted:
        def kernel(src_ref, tgt_ref, w_ref, wacc_ref, uacc_ref):
            i = pl.program_id(1)

            @pl.when(i == 0)
            def _():
                wacc_ref[...] = jnp.zeros_like(wacc_ref)
                uacc_ref[...] = jnp.zeros_like(uacc_ref)

            # In-kernel up-cast: stream native dtype from HBM, cast on the VPU.
            s = src_ref[...].astype(jnp.float32)
            t = tgt_ref[...].astype(jnp.float32)
            w = w_ref[...].astype(jnp.float32)
            d = s - t
            wd = w * d                      # w*src - w*tgt
            wacc_ref[...] += _fold(elem(wd))[None]
            uacc_ref[...] += _fold(elem(d))[None]
    else:
        def kernel(src_ref, tgt_ref, uacc_ref):
            i = pl.program_id(1)

            @pl.when(i == 0)
            def _():
                uacc_ref[...] = jnp.zeros_like(uacc_ref)

            d = src_ref[...].astype(jnp.float32) - tgt_ref[...].astype(jnp.float32)
            uacc_ref[...] += _fold(elem(d))[None]

    return kernel


def _to_slab(x, m_pad):
    """Flatten to 1-D, zero-pad, reshape to a lane-dense (m_pad, 128) slab."""
    flat = x.reshape(-1)
    pad = m_pad * LANE - flat.size
    if pad:
        flat = jnp.pad(flat, (0, pad))  # zeros contribute nothing to either sum
    return flat.reshape(m_pad, LANE)


def weighted_loss(src, tgt, weight=None, reduction="mean", loss_type="L2"):
    """Pallas implementation of WeightedLoss.forward.

    Returns (loss_fn(weight*src, weight*tgt), loss_fn(src, tgt)).
    """
    if reduction not in ("mean", "sum"):
        # TODO(synk): reduction='none' would return elementwise loss tensors.
        raise NotImplementedError("reduction must be 'mean' or 'sum'")

    n = src.size
    m = -(-n // LANE)                                   # rows of 128 lanes
    tm = min(TM_MAX, _round_up(m, SUBLANE_ALIGN))       # block rows (VMEM-budget aware)
    m_pad = _round_up(m, NCORES * tm)                   # pad rows so the grid divides evenly
    steps = m_pad // (NCORES * tm)
    grid = (NCORES, steps)

    in_spec = pl.BlockSpec((tm, LANE), lambda c, i: (c * steps + i, 0))
    acc_spec = pl.BlockSpec((1, ACC_SUBLANES, LANE), lambda c, i: (c, 0, 0))
    acc_shape = jax.ShapeDtypeStruct((NCORES, ACC_SUBLANES, LANE), jnp.float32)
    compiler_params = pltpu.CompilerParams(
        dimension_semantics=("parallel", "arbitrary"),
        vmem_limit_bytes=VMEM_LIMIT,
    )

    weighted = weight is not None
    kernel = _make_kernel(weighted, loss_type)

    src2 = _to_slab(src, m_pad)
    tgt2 = _to_slab(tgt, m_pad)

    if weighted:
        w2 = _to_slab(weight, m_pad)
        wacc, uacc = pl.pallas_call(
            kernel,
            out_shape=(acc_shape, acc_shape),
            grid_spec=pltpu.PrefetchScalarGridSpec(
                num_scalar_prefetch=0,
                grid=grid,
                in_specs=[in_spec, in_spec, in_spec],
                out_specs=(acc_spec, acc_spec),
            ),
            compiler_params=compiler_params,
        )(src2, tgt2, w2)
        wsum = jnp.sum(wacc)
        usum = jnp.sum(uacc)
    else:
        # weight=None is an all-ones weight: weighted and unweighted losses are
        # identical, so run the cheaper 2-input kernel once (no ones tensor).
        uacc = pl.pallas_call(
            kernel,
            out_shape=acc_shape,
            grid_spec=pltpu.PrefetchScalarGridSpec(
                num_scalar_prefetch=0,
                grid=grid,
                in_specs=[in_spec, in_spec],
                out_specs=acc_spec,
            ),
            compiler_params=compiler_params,
        )(src2, tgt2)
        usum = jnp.sum(uacc)
        wsum = usum

    if reduction == "mean":
        denom = jnp.float32(n)
        return wsum / denom, usum / denom
    return wsum, usum


if __name__ == "__main__":
    key = jax.random.PRNGKey(0)
    k1, k2, k3 = jax.random.split(key, 3)

    B, C, H, W = 2, 4, 16, 16
    src = jax.random.normal(k1, (B, C, H, W), dtype=jnp.float32)
    tgt = jax.random.normal(k2, (B, C, H, W), dtype=jnp.float32)
    weight = jax.random.uniform(k3, (B, C, H, W), dtype=jnp.float32)

    # Weighted L2 path
    w_loss, u_loss = weighted_loss(src, tgt, weight)
    jax.block_until_ready((w_loss, u_loss))
    ref_w = jnp.mean((weight * src - weight * tgt) ** 2)
    ref_u = jnp.mean((src - tgt) ** 2)
    assert jnp.allclose(w_loss, ref_w, rtol=1e-5, atol=1e-6), (w_loss, ref_w)
    assert jnp.allclose(u_loss, ref_u, rtol=1e-5, atol=1e-6), (u_loss, ref_u)

    # weight=None path (2-input kernel, wsum == usum)
    w_loss2, u_loss2 = weighted_loss(src, tgt, None)
    jax.block_until_ready((w_loss2, u_loss2))
    assert jnp.allclose(w_loss2, u_loss2, rtol=1e-6)
    assert jnp.allclose(u_loss2, ref_u, rtol=1e-5, atol=1e-6), (u_loss2, ref_u)

    # L1 variant
    l1_w, l1_u = weighted_loss(src, tgt, weight, loss_type="L1")
    jax.block_until_ready((l1_w, l1_u))
    ref_l1w = jnp.mean(jnp.abs(weight * src - weight * tgt))
    ref_l1u = jnp.mean(jnp.abs(src - tgt))
    assert jnp.allclose(l1_w, ref_l1w, rtol=1e-5, atol=1e-6), (l1_w, ref_l1w)
    assert jnp.allclose(l1_u, ref_l1u, rtol=1e-5, atol=1e-6), (l1_u, ref_l1u)

    print("KERNEL_OK")
</pallas_src>

<mosaic_0001>
module attributes {stable_mosaic.version = 11 : i64} {
  func.func @kernel(%arg0: i32, %arg1: i32, %arg2: memref<32x128xf32, #tpu.memory_space<vmem>>, %arg3: memref<32x128xf32, #tpu.memory_space<vmem>>, %arg4: memref<32x128xf32, #tpu.memory_space<vmem>>, %arg5: memref<1x8x128xf32, #tpu.memory_space<vmem>>, %arg6: memref<1x8x128xf32, #tpu.memory_space<vmem>>) attributes {dimension_semantics = [#tpu.dimension_semantics<parallel>, #tpu.dimension_semantics<arbitrary>], iteration_bounds = array<i64: 2, 1>, scalar_prefetch = 0 : i64, scratch_operands = 0 : i64, tpu.core_type = #tpu.core_type<tc>, window_params = [{transform_indices = @transform_0, window_bounds = array<i64: 32, 128>}, {transform_indices = @transform_1, window_bounds = array<i64: 32, 128>}, {transform_indices = @transform_2, window_bounds = array<i64: 32, 128>}, {transform_indices = @transform_3, window_bounds = array<i64: 1, 8, 128>}, {transform_indices = @transform_4, window_bounds = array<i64: 1, 8, 128>}]} {
    %c0_i32 = arith.constant 0 : i32
    %0 = arith.cmpi eq, %arg1, %c0_i32 : i32
    %1 = arith.extui %0 : i1 to i32
    %c0_i32_0 = arith.constant 0 : i32
    %2 = arith.cmpi ne, %1, %c0_i32_0 : i32
    scf.if %2 {
      %cst_19 = arith.constant 0.000000e+00 : f32
      %22 = vector.broadcast %cst_19 : f32 to vector<1x8x128xf32>
      %c0_20 = arith.constant 0 : index
      %c0_21 = arith.constant 0 : index
      %c0_22 = arith.constant 0 : index
      %23 = vector.load %arg5[%c0_20, %c0_21, %c0_22] : memref<1x8x128xf32, #tpu.memory_space<vmem>>, vector<1x8x128xf32>
      tpu.vector_store %arg5[%c0_20, %c0_21, %c0_22], %22 {strides = array<i32>} : memref<1x8x128xf32, #tpu.memory_space<vmem>>, vector<1x8x128xf32>,
      %cst_23 = arith.constant 0.000000e+00 : f32
      %24 = vector.broadcast %cst_23 : f32 to vector<1x8x128xf32>
      %c0_24 = arith.constant 0 : index
      %c0_25 = arith.constant 0 : index
      %c0_26 = arith.constant 0 : index
      %25 = vector.load %arg6[%c0_24, %c0_25, %c0_26] : memref<1x8x128xf32, #tpu.memory_space<vmem>>, vector<1x8x128xf32>
      tpu.vector_store %arg6[%c0_24, %c0_25, %c0_26], %24 {strides = array<i32>} : memref<1x8x128xf32, #tpu.memory_space<vmem>>, vector<1x8x128xf32>,
    } else {
    }
    %c0 = arith.constant 0 : index
    %c0_1 = arith.constant 0 : index
    %3 = vector.load %arg2[%c0, %c0_1] : memref<32x128xf32, #tpu.memory_space<vmem>>, vector<32x128xf32>
    %c0_2 = arith.constant 0 : index
    %c0_3 = arith.constant 0 : index
    %4 = vector.load %arg3[%c0_2, %c0_3] : memref<32x128xf32, #tpu.memory_space<vmem>>, vector<32x128xf32>
    %c0_4 = arith.constant 0 : index
    %c0_5 = arith.constant 0 : index
    %5 = vector.load %arg4[%c0_4, %c0_5] : memref<32x128xf32, #tpu.memory_space<vmem>>, vector<32x128xf32>
    %6 = arith.subf %3, %4 : vector<32x128xf32>
    %7 = arith.mulf %5, %6 : vector<32x128xf32>
    %c0_6 = arith.constant 0 : index
    %c0_7 = arith.constant 0 : index
    %c0_8 = arith.constant 0 : index
    %8 = vector.load %arg5[%c0_6, %c0_7, %c0_8] : memref<1x8x128xf32, #tpu.memory_space<vmem>>, vector<1x8x128xf32>
    %9 = arith.mulf %7, %7 : vector<32x128xf32>
    %10 = vector.shape_cast %9 : vector<32x128xf32> to vector<4x8x128xf32>
    %cst = arith.constant dense<0.000000e+00> : vector<8x128xf32>
    %11 = vector.multi_reduction <add>, %10, %cst [0] : vector<4x8x128xf32> to vector<8x128xf32>
    %12 = vector.shape_cast %11 : vector<8x128xf32> to vector<1x8x128xf32>
    %13 = arith.addf %8, %12 : vector<1x8x128xf32>
    %c0_9 = arith.constant 0 : index
    %c0_10 = arith.constant 0 : index
    %c0_11 = arith.constant 0 : index
    %14 = vector.load %arg5[%c0_9, %c0_10, %c0_11] : memref<1x8x128xf32, #tpu.memory_space<vmem>>, vector<1x8x128xf32>
    tpu.vector_store %arg5[%c0_9, %c0_10, %c0_11], %13 {strides = array<i32>} : memref<1x8x128xf32, #tpu.memory_space<vmem>>, vector<1x8x128xf32>,
    %c0_12 = arith.constant 0 : index
    %c0_13 = arith.constant 0 : index
    %c0_14 = arith.constant 0 : index
    %15 = vector.load %arg6[%c0_12, %c0_13, %c0_14] : memref<1x8x128xf32, #tpu.memory_space<vmem>>, vector<1x8x128xf32>
    %16 = arith.mulf %6, %6 : vector<32x128xf32>
    %17 = vector.shape_cast %16 : vector<32x128xf32> to vector<4x8x128xf32>
    %cst_15 = arith.constant dense<0.000000e+00> : vector<8x128xf32>
    %18 = vector.multi_reduction <add>, %17, %cst_15 [0] : vector<4x8x128xf32> to vector<8x128xf32>
    %19 = vector.shape_cast %18 : vector<8x128xf32> to vector<1x8x128xf32>
    %20 = arith.addf %15, %19 : vector<1x8x128xf32>
    %c0_16 = arith.constant 0 : index
    %c0_17 = arith.constant 0 : index
    %c0_18 = arith.constant 0 : index
    %21 = vector.load %arg6[%c0_16, %c0_17, %c0_18] : memref<1x8x128xf32, #tpu.memory_space<vmem>>, vector<1x8x128xf32>
    tpu.vector_store %arg6[%c0_16, %c0_17, %c0_18], %20 {strides = array<i32>} : memref<1x8x128xf32, #tpu.memory_space<vmem>>, vector<1x8x128xf32>,
    return
  }
  func.func @transform_0(%arg0: i32, %arg1: i32) -> (i32, i32) {
    %c1_i32 = arith.constant 1 : i32
    %0 = arith.muli %arg0, %c1_i32 : i32
    %1 = arith.addi %0, %arg1 : i32
    %c0_i32 = arith.constant 0 : i32
    %c0_i32_0 = arith.constant 0 : i32
    return %1, %c0_i32 : i32, i32
  }
  func.func @transform_1(%arg0: i32, %arg1: i32) -> (i32, i32) {
    %c1_i32 = arith.constant 1 : i32
    %0 = arith.muli %arg0, %c1_i32 : i32
    %1 = arith.addi %0, %arg1 : i32
    %c0_i32 = arith.constant 0 : i32
    %c0_i32_0 = arith.constant 0 : i32
    return %1, %c0_i32 : i32, i32
  }
  func.func @transform_2(%arg0: i32, %arg1: i32) -> (i32, i32) {
    %c1_i32 = arith.constant 1 : i32
    %0 = arith.muli %arg0, %c1_i32 : i32
    %1 = arith.addi %0, %arg1 : i32
    %c0_i32 = arith.constant 0 : i32
    %c0_i32_0 = arith.constant 0 : i32
    return %1, %c0_i32 : i32, i32
  }
  func.func @transform_3(%arg0: i32, %arg1: i32) -> (i32, i32, i32) {
    %c0_i32 = arith.constant 0 : i32
    %c0_i32_0 = arith.constant 0 : i32
    %c0_i32_1 = arith.constant 0 : i32
    return %arg0, %c0_i32, %c0_i32_0 : i32, i32, i32
  }
  func.func @transform_4(%arg0: i32, %arg1: i32) -> (i32, i32, i32) {
    %c0_i32 = arith.constant 0 : i32
    %c0_i32_0 = arith.constant 0 : i32
    %c0_i32_1 = arith.constant 0 : i32
    return %arg0, %c0_i32, %c0_i32_0 : i32, i32, i32
  }
}

</mosaic_0001>

<bundles_post_ra>
// kernel: tpu_custom_call.1
= control target key start
LH: loop header
LB: loop body
LE: loop exit
PB: predicated region body
PF: predicated region fallthrough
CT: control target
= control target key end

     0   :  { %s1225_s0 = inlined_call_operand.hbm [shape: f32[64,128], index: 0, kind: input, shape index: {}]   ;;  %s1226_s1 = inlined_call_operand.hbm [shape: f32[64,128], index: 1, kind: input, shape index: {}]   ;;  %s1227_s2 = inlined_call_operand.hbm [shape: f32[64,128], index: 2, kind: input, shape index: {}]   ;;  %s1228_s3 = inlined_call_operand.hbm [shape: f32[2,8,128], index: 3, kind: output, shape index: {0}]   ;;  %s1229_s4 = inlined_call_operand.hbm [shape: f32[2,8,128], index: 4, kind: output, shape index: {1}]  }
   0x1   :  { %1241 = sst [smem:[#allocation19_spill]] %s1226_s1 }
   0x2   :  { %10 = vsyncpa [#allocation3], 0 }
   0x3   :  { %12 = vsyncpa [#allocation3 + $0x1], 0 }
   0x4   :  { %13 = vsyncpa [#allocation6], 0 }
   0x5   :  { %15 = vsyncpa [#allocation6 + $0x1], 0 }
   0x6   :  { %16 = vsyncpa [#allocation4], 0 }
   0x7   :  { %18 = vsyncpa [#allocation4 + $0x1], 0 }
   0x8   :  { %19 = vsyncpa [#allocation10], 0 }
   0x9   :  { %21 = vsyncpa [#allocation10 + $0x1], 0  ;;  %s915_s15 = smov 0   ;;  %s917_s16 = smov 0  }
   0xa   :  { %s919_s17 = smov 0   ;;  %s921_s18 = smov 0  }
   0xb   :  { %s923_s19 = smov 0   ;;  %s925_s20 = smov 0  }
   0xc LB: > { %1242 = sst [smem:[#allocation15_spill]] %s877_s19  ;;  %s946_s21 = sadd.s32 4294967295, %s881_s20   ;;  %s881_s20 = sphi %s925_s20, %s27_s20   ;;  %s877_s19 = sphi %s923_s19, %s1267_s19   ;;  %s873_s18 = sphi %s921_s18, %s1266_s18   ;;  %s869_s17 = sphi %s919_s17, %s1270_s17   ;;  %s865_s16 = sphi %s917_s16, %s1269_s16   ;;  %s861_s15 = sphi %s915_s15, %s1268_s15  }
   0xd   : > { %1243 = sst [smem:[#allocation16_spill]] %s881_s20  ;;  %s566_s22 = sadd.s32 4294967294, %s881_s20  }
   0xe   : > { %s39_s23 = sadd.s32 1, %s877_s19  ;;  %s48_s24 = sadd.s32 1, %s869_s17 }
   0xf   : > { %p41_p0 = scmp.ge.s32.totalorder %s39_s23, 2  ;;  %p55_p1 = scmp.ne.s32.totalorder %s869_s17, %s865_s16 }
  0x10   : > { %p56_p2 = scmp.eq.s32.totalorder %s881_s20, 0  ;;  %p61_p3 = scmp.ne.s32.totalorder %s865_s16, %s861_s15 }
  0x11   : > { %s1272_s23 = smov (%p41_p0, %s39_s23), 0  ;;  %p62_p5 = scmp.eq.s32.totalorder %s946_s21, 0 }
  0x12   : > { %1244 = sst [smem:[#allocation17_spill]] %s1272_s23  ;;  %p958_p4 = por %p56_p2, %p55_p1 }
  0x13   : > { %s45_s26 = ssub.s32 %s877_s19, %s1272_s23  ;;  %p141_p6 = scmp.eq.s32.totalorder %s946_s21, 1 }
  0x14   : > { %p46_p7 = scmp.eq.s32.totalorder %s45_s26, 0  ;;  %p966_p8 = por %p62_p5, %p61_p3 }
  0x15   : > { %p970_p9 = por %p141_p6, %p55_p1  ;;  %p147_p10 = scmp.eq.s32.totalorder %s566_s22, 1 }
  0x16   : > { %s1246_s27 = scalar_select %p966_p8, 1, 0 }
  0x17   : > { %s1247_s28 = scalar_select %p970_p9, 1, 0 }
  0x18   : > { %s975_s29 = scalar_select %p46_p7, %s869_s17, %s48_s24  }
  0x19   : > { %p977_p11 = por %p147_p10, %p61_p3  ;;  %p620_p13 = scmp.lt.s32.totalorder %s881_s20, 2 }
  0x1a   : > { %1248 = sst [smem:[#allocation18_spill]] %s975_s29  ;;  %s1230_s5 = sand.u32 1, %s869_s17  }
  0x1b   : > { %s1249_s30 = scalar_select %p977_p11, 1, 0 }
  0x1c   : > { %s986_s6 = sshll.u32 %s1230_s5, 5  ;;  %s989_s7 = sshll.u32 %s877_s19, 9 }
  0x1d   : > { %p993_p0 = pnand %p620_p13, %p958_p4  ;;  %s215_s9 = sand.u32 1, %s881_s20  }
  0x1e   : > { %s1251_s1 = sld [smem:[#allocation19_spill]]  ;;  %s219_s13 = scalar_lea.vmem [#allocation5], %s986_s6 }
  0x1f   : > { %s227_s14 = sshll.u32 %s219_s13, 4  ;;  %s1009_s22 = scalar_lea.sflag [#allocation6], %s215_s9  ;;  %s1006_s14 = int_to_ptr.vmem [resolvable:$true] %s227_s14 }
  0x20   : > { %p1015_p4 = pneg %p993_p0 }
  0x24   : > { %s1002_s12 = scalar_lea.hbm %s1251_s1, %s989_s7  ;;  %s678_s11 = scalar_lea.hbm %s1251_s1, 1024 }
  0x25   : > { %s673_s24 = scalar_lea.hbm %s1002_s12, 512  ;;  %p679_p7 = scmp.lt.u32.totalorder %s1002_s12, %s1251_s1 }
  0x26   : > { %p674_p3 = scmp.ne.s32.totalorder %s1002_s12, %s673_s24  ;;  %p680_p10 = scmp.lt.u32.totalorder %s678_s11, %s673_s24 }
  0x27   : > { %p682_p12 = scmp.lt.u32.totalorder %s673_s24, %s1002_s12 }
  0x28   : > { %p676_p5 = pnand %p1015_p4, %p674_p3  ;;  %p681_p13 = por %p680_p10, %p679_p7 }
  0x2a   : > { %p677_p6 = pneg %p676_p5  ;;  %p683_p1 = por %p682_p12, %p681_p13 }
  0x2c   : > { %p684_p2 = pnand %p683_p1, %p677_p6 }
  0x2e   : > { %687 = shalt.err (!%p684_p2)
}
  0x2f   : > { %s688_s9 = scalar_lea.vmem %s1006_s14, 512  ;;  %s883_s26 = smov [#allocation5]  }
  0x30   : > { %p689_p3 = scmp.ne.s32.totalorder %s1006_s14, %s688_s9  ;;  %s693_s10 = sshll.u32 %s883_s26, 4  ;;  %s694_s10 = int_to_ptr.vmem [resolvable:$false] %s693_s10 }
  0x31   : > { %s695_s5 = scalar_lea.vmem %s694_s10, 1024  ;;  %p696_p9 = scmp.lt.s32.totalorder %s1006_s14, %s694_s10 }
  0x32   : > { %p691_p5 = pnand %p689_p3, %p1015_p4  ;;  %p697_p8 = scmp.lt.s32.totalorder %s695_s5, %s688_s9 }
  0x34   : > { %p692_p11 = pneg %p691_p5  ;;  %p698_p7 = por %p697_p8, %p696_p9 }
  0x36   : > { %p699_p10 = pnand %p698_p7, %p692_p11 }
  0x38   : > { %702 = shalt.err (!%p699_p10)
}
  0x39   : > { %s1233_s24 = smov 128   ;;  %s1235_s11 = smov 8  }
  0x3a   : > { %609 = dma.hbm_to_vmem [thread:$0]  (!%p993_p0), %s1002_s12, 512, %s1006_s14, %s1009_s22, %s1233_s24, %s1233_s24, %s1235_s11  }
  0x3b   : > { %p1253_p8 = scmp.lt.s32.totalorder %s881_s20, 3  ;;  %p1254_p9 = scmp.ge.s32.totalorder %s881_s20, 1 }
  0x3c   : > { %s1054_s10 = scalar_lea.hbm %s1225_s0, %s989_s7  ;;  %s197_s5 = scalar_lea.vmem [#allocation2], %s986_s6 }
  0x3d   : > { %p1046_p11 = pnand %p1254_p9, %p1253_p8  ;;  %s205_s1 = sshll.u32 %s197_s5, 4  ;;  %s1057_s1 = int_to_ptr.vmem [resolvable:$true] %s205_s1 }
  0x3e   : > { %s1063_s24 = scalar_lea.hbm %s1227_s2, %s989_s7  ;;  %s1256_s11 = sand.u32 1, %s869_s17  }
  0x3f   : > { %s1255_s13 = scalar_select %p1046_p11, 1, 0 }
  0x40   : > { %s1067_s23 = scalar_lea.sflag [#allocation3], %s1256_s11  ;;  %s703_s19 = scalar_lea.hbm %s1054_s10, 512 }
  0x41   : > { %p704_p12 = scmp.ne.s32.totalorder %s1054_s10, %s703_s19  ;;  %s708_s29 = scalar_lea.hbm %s1225_s0, 1024 }
  0x42   : > { %p709_p6 = scmp.lt.u32.totalorder %s1054_s10, %s1225_s0  ;;  %p710_p13 = scmp.lt.u32.totalorder %s708_s29, %s703_s19 }
  0x43   : > { %p706_p1 = pnand %p704_p12, %p1015_p4  ;;  %p712_p5 = scmp.lt.u32.totalorder %s703_s19, %s1054_s10 }
  0x44   : > { %p711_p3 = por %p710_p13, %p709_p6 }
  0x45   : > { %p707_p2 = pneg %p706_p1 }
  0x46   : > { %p713_p7 = por %p712_p5, %p711_p3 }
  0x48   : > { %p714_p10 = pnand %p713_p7, %p707_p2 }
  0x4a   : > { %717 = shalt.err (!%p714_p10)
}
  0x4b   : > { %s718_s7 = scalar_lea.vmem %s1057_s1, 512  ;;  %s886_s11 = smov [#allocation2]  }
  0x4c   : > { %p719_p8 = scmp.ne.s32.totalorder %s1057_s1, %s718_s7  ;;  %s723_s12 = sshll.u32 %s886_s11, 4  ;;  %s724_s12 = int_to_ptr.vmem [resolvable:$false] %s723_s12 }
  0x4d   : > { %s725_s20 = scalar_lea.vmem %s724_s12, 1024  ;;  %p726_p1 = scmp.lt.s32.totalorder %s1057_s1, %s724_s12 }
  0x4e   : > { %p721_p9 = pnand %p719_p8, %p1015_p4  ;;  %p727_p11 = scmp.lt.s32.totalorder %s725_s20, %s718_s7 }
  0x50   : > { %p722_p12 = pneg %p721_p9  ;;  %p728_p6 = por %p727_p11, %p726_p1 }
  0x52   : > { %p729_p13 = pnand %p728_p6, %p722_p12 }
  0x54   : > { %732 = shalt.err (!%p729_p13)
}
  0x55   : > { %s1257_s19 = smov 8   ;;  %s1258_s29 = smov 128  }
  0x56   : > { %606 = dma.hbm_to_vmem [thread:$0]  (!%p993_p0), %s1054_s10, 512, %s1057_s1, %s1067_s23, %s1258_s29, %s1258_s29, %s1257_s19  }
  0x57   : > { %s241_s14 = scalar_lea.vmem [#allocation7], %s986_s6  ;;  %s733_s26 = scalar_lea.hbm %s1063_s24, 512 }
  0x58   : > { %s249_s9 = sshll.u32 %s241_s14, 4  ;;  %p734_p11 = scmp.ne.s32.totalorder %s1063_s24, %s733_s26  ;;  %s1095_s9 = int_to_ptr.vmem [resolvable:$true] %s249_s9 }
  0x59   : > { %s738_s11 = scalar_lea.hbm %s1227_s2, 1024  ;;  %p739_p5 = scmp.lt.u32.totalorder %s1063_s24, %s1227_s2 }
  0x5a   : > { %p736_p2 = pnand %p734_p11, %p1015_p4  ;;  %p740_p7 = scmp.lt.u32.totalorder %s738_s11, %s733_s26 }
  0x5b   : > { %p742_p8 = scmp.lt.u32.totalorder %s733_s26, %s1063_s24 }
  0x5c   : > { %p737_p3 = pneg %p736_p2  ;;  %p741_p10 = por %p740_p7, %p739_p5 }
  0x5e   : > { %p743_p9 = por %p742_p8, %p741_p10 }
  0x60   : > { %p744_p12 = pnand %p743_p9, %p737_p3 }
  0x62   : > { %747 = shalt.err (!%p744_p12)
}
  0x63   : > { %s748_s1 = scalar_lea.vmem %s1095_s9, 512  ;;  %s887_s23 = smov [#allocation7]  }
  0x64   : > { %p749_p1 = scmp.ne.s32.totalorder %s1095_s9, %s748_s1  ;;  %s753_s6 = sshll.u32 %s887_s23, 4  ;;  %s754_s6 = int_to_ptr.vmem [resolvable:$false] %s753_s6 }
  0x65   : > { %s755_s10 = scalar_lea.vmem %s754_s6, 1024  ;;  %p756_p11 = scmp.lt.s32.totalorder %s1095_s9, %s754_s6 }
  0x66   : > { %p751_p6 = pnand %p749_p1, %p1015_p4  ;;  %p757_p2 = scmp.lt.s32.totalorder %s755_s10, %s748_s1 }
  0x68   : > { %p752_p13 = pneg %p751_p6  ;;  %p758_p5 = por %p757_p2, %p756_p11 }
  0x6a   : > { %p759_p7 = pnand %p758_p5, %p752_p13 }
  0x6c   : > { %762 = shalt.err (!%p759_p7)
}
  0x6d   : > { %612 = dma.hbm_to_vmem [thread:$0]  (!%p993_p0), %s1063_s24, 512, %s1095_s9, %s1009_s22, %s1258_s29, %s1258_s29, %s1257_s19  }
  0x6e   : > { %p1259_p4 = scmp.ne.s32.totalorder %s1255_s13, 0 }
  0x6f   : > { %s1125_s25 = sand.u32 (!%p1259_p4), 1, %s865_s16   ;;  %p1260_p3 = scmp.ne.s32.totalorder (!%p1259_p4), %s1246_s27, 0 }
  0x70   : > { %261 = sbr.rel (%p1259_p4) target bundleno = 174 (0xae), region = 32  ;;  %s579_s14 = sshll.u32 (!%p1259_p4), %s1125_s25, 5 }
  0x71   : > { %s264_s26 = scalar_lea.sflag (!%p1259_p4), [#allocation3], %s1125_s25  ;;  %s267_s5 = scalar_lea.vmem (!%p1259_p4), [#allocation2], %s579_s14 }
  0x77   : > { %844 = dma.done.wait (%p1260_p3), %s264_s26, 512  }
  0x78   : > { %846 = vsyncadd (%p1260_p3), %s264_s26, 4294966784  ;;  %s272_s8 = sand.u32 1, %s946_s21   ;;  %s276_s24 = scalar_lea.vmem [#allocation5], %s579_s14 }
  0x79   : > { %s273_s22 = scalar_lea.sflag [#allocation6], %s272_s8 }
  0x7a   : > { %848 = dma.done.wait (%p1260_p3), %s273_s22, 1024  }
  0x7b   : > { %850 = vsyncadd (%p1260_p3), %s273_s22, 4294966272  ;;  %v337_v0 = vld [vmem:[%s267_s5] sm:$0xff]  ;;  %v338_v1 = vld [vmem:[%s267_s5 + $0x8] sm:$0xff]  ;;  %s285_s13 = scalar_lea.vmem [#allocation7], %s579_s14  ;;  %s582_s21 = sshll.u32 %s1125_s25, 3 }
  0x7c   : > { %v339_v2 = vld [vmem:[%s267_s5 + $0x10] sm:$0xff]  ;;  %v340_v3 = vld [vmem:[%s267_s5 + $0x18] sm:$0xff]  ;;  %v341_v4 = vld [vmem:[%s276_s24] sm:$0xff]  ;;  %s586_s27 = sshll.u32 %s873_s18, 7  ;;  %s324_s19 = scalar_lea.vmem [#allocation9], %s582_s21 }
  0x7d   : > { %v342_v5 = vld [vmem:[%s276_s24 + $0x8] sm:$0xff]  ;;  %v343_v6 = vld [vmem:[%s276_s24 + $0x10] sm:$0xff]  ;;  %v344_v7 = vld [vmem:[%s276_s24 + $0x18] sm:$0xff]  ;;  %v349_v9 = vsub.f32 %v337_v0, %v341_v4  ;;  %s409_s29 = sshll.u32 %s324_s19, 4  ;;  %s1140_s9 = scalar_lea.vmem [#allocation8], %s582_s21  ;;  %s1148_s29 = int_to_ptr.vmem [resolvable:$true] %s409_s29 }
  0x7e   : > { %v345_v8 = vld [vmem:[%s285_s13] sm:$0xff]  ;;  %v350_v10 = vsub.f32 %v338_v1, %v342_v5  ;;  %v346_v11 = vld [vmem:[%s285_s13 + $0x8] sm:$0xff]  ;;  %v347_v12 = vld [vmem:[%s285_s13 + $0x10] sm:$0xff]  ;;  %v351_v14 = vsub.f32 %v339_v2, %v343_v6  ;;  %v352_v15 = vsub.f32 %v340_v3, %v344_v7  ;;  %s396_s7 = sshll.u32 %s1140_s9, 4  ;;  %s1146_s20 = scalar_lea.hbm %s1229_s4, %s586_s27  ;;  %s1155_s7 = int_to_ptr.vmem [resolvable:$true] %s396_s7 }
  0x7f   : > { %v348_v13 = vld [vmem:[%s285_s13 + $0x18] sm:$0xff]  ;;  %v353_v16 = vmul.f32 %v349_v9, %v345_v8  ;;  %v368_v18 = vmul.f32 %v349_v9, %v349_v9  ;;  %s1153_s23 = scalar_lea.hbm %s1228_s3, %s586_s27  ;;  %s383_s6 = scalar_lea.sflag [#allocation10], %s1125_s25 }
  0x80   : > { %v354_v17 = vmul.f32 %v350_v10, %v346_v11  ;;  %v369_v19 = vmul.f32 %v350_v10, %v350_v10  ;;  %v355_v20 = vmul.f32 %v351_v14, %v347_v12  ;;  %v356_v21 = vmul.f32 %v352_v15, %v348_v13  ;;  %s763_s10 = scalar_lea.vmem %s1148_s29, 128  ;;  %p1261_p10 = scmp.ne.s32.totalorder %s1247_s28, 0 }
  0x81   : > { %v370_v22 = vmul.f32 %v351_v14, %v351_v14  ;;  %v358_v23 = vmul.f32 %v353_v16, %v353_v16  ;;  %v371_v25 = vmul.f32 %v352_v15, %v352_v15  ;;  %p764_p0 = scmp.ne.s32.totalorder %s1148_s29, %s763_s10  ;;  %s888_s14 = smov [#allocation9]  }
  0x82   : > { %v359_v24 = vmul.f32 %v354_v17, %v354_v17  ;;  %v372_v26 = vadd.f32 %v369_v19, %v368_v18  ;;  %v360_v27 = vmul.f32 %v355_v20, %v355_v20  ;;  %v361_v28 = vmul.f32 %v356_v21, %v356_v21  ;;  %s767_s26 = sshll.u32 %s888_s14, 4  ;;  %s768_s26 = int_to_ptr.vmem [resolvable:$false] %s767_s26 }
  0x83   : > { %p765_p8 = pnand %p764_p0, %p1261_p10  ;;  %s769_s5 = scalar_lea.vmem %s768_s26, 256 }
  0x84   : > { %v362_v29 = vadd.f32 %v359_v24, %v358_v23  ;;  %v373_v30 = vadd.f32 %v372_v26, %v370_v22  ;;  %p770_p12 = scmp.lt.s32.totalorder %s1148_s29, %s768_s26  ;;  %p771_p1 = scmp.lt.s32.totalorder %s769_s5, %s763_s10 }
  0x85   : > { %p766_p9 = pneg %p765_p8 }
  0x86   : > { %v363_v31 = vadd.f32 %v362_v29, %v360_v27  ;;  %v374_v32 = vadd.f32 %v373_v30, %v371_v25  ;;  %p772_p6 = por %p771_p1, %p770_p12 }
  0x88   : > { %v364_v33 = vadd.f32 %v363_v31, %v361_v28  ;;  %376 = vst [vmem:[%s324_s19] sm:$0xff] %v374_v32  ;;  %p773_p13 = pnand %p772_p6, %p766_p9 }
  0x8a   : > { %776 = shalt.err (!%p773_p13)
}
  0x8b   : > { %s777_s8 = scalar_lea.hbm %s1146_s20, 128  ;;  %s781_s13 = scalar_lea.hbm %s1229_s4, 256 }
  0x8c   : > { %p778_p11 = scmp.ne.s32.totalorder %s1146_s20, %s777_s8  ;;  %p782_p7 = scmp.lt.u32.totalorder %s1146_s20, %s1229_s4 }
  0x8d   : > { %p783_p4 = scmp.lt.u32.totalorder %s781_s13, %s777_s8  ;;  %p785_p0 = scmp.lt.u32.totalorder %s777_s8, %s1146_s20 }
  0x8e   : > { %p779_p2 = pnand %p778_p11, %p1261_p10 }
  0x8f   : > { %p784_p3 = por %p783_p4, %p782_p7 }
  0x90   : > { %p780_p5 = pneg %p779_p2 }
  0x91   : > { %p786_p8 = por %p785_p0, %p784_p3 }
  0x93   : > { %p787_p9 = pnand %p786_p8, %p780_p5 }
  0x95   : > { %790 = shalt.err (!%p787_p9)
}
  0x96   : > { %600 = dma.vmem_to_hbm [thread:$0]  (%p1261_p10), %s1148_s29, 128, %s1146_s20, %s383_s6   ;;  %366 = vst [vmem:[%s1140_s9] sm:$0xff] %v364_v33 }
  0x97   : > { %s378_s19 = scalar_lea.sflag [#allocation4], %s1125_s25  ;;  %s791_s11 = scalar_lea.vmem %s1155_s7, 128 }
  0x98   : > { %p792_p12 = scmp.ne.s32.totalorder %s1155_s7, %s791_s11  ;;  %s889_s12 = smov [#allocation8]  }
  0x99   : > { %s795_s18 = sshll.u32 %s889_s12, 4  ;;  %s796_s18 = int_to_ptr.vmem [resolvable:$false] %s795_s18 }
  0x9a   : > { %p793_p1 = pnand %p792_p12, %p1261_p10  ;;  %s797_s1 = scalar_lea.vmem %s796_s18, 256 }
  0x9b   : > { %p798_p13 = scmp.lt.s32.totalorder %s1155_s7, %s796_s18  ;;  %p799_p11 = scmp.lt.s32.totalorder %s797_s1, %s791_s11 }
  0x9c   : > { %p794_p6 = pneg %p793_p1 }
  0x9d   : > { %p800_p2 = por %p799_p11, %p798_p13 }
  0x9f   : > { %p801_p5 = pnand %p800_p2, %p794_p6 }
  0xa1   : > { %804 = shalt.err (!%p801_p5)
}
  0xa2   : > { %s805_s25 = scalar_lea.hbm %s1153_s23, 128  ;;  %s809_s20 = scalar_lea.hbm %s1228_s3, 256 }
  0xa3   : > { %p806_p7 = scmp.ne.s32.totalorder %s1153_s23, %s805_s25  ;;  %p810_p0 = scmp.lt.u32.totalorder %s1153_s23, %s1228_s3 }
  0xa4   : > { %p811_p8 = scmp.lt.u32.totalorder %s809_s20, %s805_s25  ;;  %p813_p12 = scmp.lt.u32.totalorder %s805_s25, %s1153_s23 }
  0xa5   : > { %p807_p4 = pnand %p806_p7, %p1261_p10 }
  0xa6   : > { %p812_p9 = por %p811_p8, %p810_p0 }
  0xa7   : > { %p808_p3 = pneg %p807_p4 }
  0xa8   : > { %p814_p1 = por %p813_p12, %p812_p9 }
  0xaa   : > { %p815_p6 = pnand %p814_p1, %p808_p3 }
  0xac   : > { %818 = shalt.err (!%p815_p6)
}
  0xad   : > { %599 = dma.vmem_to_hbm [thread:$0]  (%p1261_p10), %s1155_s7, 128, %s1153_s23, %s378_s19  }
  0xae PF: > { %s1262_s14 = sld [smem:[#allocation16_spill]]  ;;  %s421_s26 = sand.u32 1, %s861_s15  }
  0xaf   : > { %p1263_p13 = scmp.ne.s32.totalorder %s1249_s30, 0  ;;  %s422_s5 = scalar_lea.sflag [#allocation4], %s421_s26 }
  0xb4   : > { %p1264_p11 = scmp.ge.s32.totalorder %s1262_s14, 2 }
  0xb6   : > { %p614_p2 = pnand %p1264_p11, %p1263_p13 }
  0xb8   : > { %852 = dma.done.wait (!%p614_p2), %s422_s5, 128  }
  0xb9   : > { %854 = vsyncadd (!%p614_p2), %s422_s5, 4294967168  ;;  %s431_s8 = scalar_lea.sflag [#allocation10], %s421_s26 }
  0xba   : > { %856 = dma.done.wait (!%p614_p2), %s431_s8, 128  }
  0xbb   : > { %858 = vsyncadd (!%p614_p2), %s431_s8, 4294967168  ;;  %s27_s20 = sadd.s32 1, %s1262_s14   ;;  %s1265_s28 = sld [smem:[#allocation18_spill]] }
  0xbc   : > { %p24_p5 = scmp.ge.s32.totalorder %s27_s20, 4   ;;  %s1266_s18 = sld [smem:[#allocation15_spill]] }
  0xbd   : > { %s1267_s19 = sld [smem:[#allocation17_spill]]  ;;  %s1268_s15 = smov %s865_s16 }
  0xbe   : > { %s1269_s16 = smov %s869_s17  ;;  %26 = sbr.rel (!%p24_p5) target bundleno = 12 (0xc), region = 122 }
  0xc1   : > { %s1270_s17 = smov %s1265_s28 }
  0xc5   :  { %436 = vsyncpa [#allocation3], 1 }
  0xc6   :  { %438 = vsyncpa [#allocation3 + $0x1], 1 }
  0xc7   :  { %439 = vsyncpa [#allocation6], 1 }
  0xc8   :  { %441 = vsyncpa [#allocation6 + $0x1], 1 }
  0xc9   :  { %442 = vsyncpa [#allocation4], 1 }
  0xca   :  { %444 = vsyncpa [#allocation4 + $0x1], 1 }
  0xcb   :  { %445 = vsyncpa [#allocation10], 1 }
  0xcc   :  { %447 = vsyncpa [#allocation10 + $0x1], 1 }

</bundles_post_ra>
